<compile_context>
chip_gen: v5e
topology: v5e:2x2
jax: 0.10.0
libtpu: 0.0.40
codegen_flags: <defaults>
</compile_context>

<pallas_src>
import functools

import jax
import jax.numpy as jnp
from jax.experimental import pallas as pl
from jax.experimental.pallas import tpu as pltpu


def _round_up(v, m):
    return ((v + m - 1) // m) * m


def _param_layout(Dp, Cp):
    """Row offsets inside the packed (R, PW) parameter buffer."""
    r_wi = 0                 # wi^T            rows [0, Dp),        cols [0, Dp)
    r_wc = Dp                # (wfc@wfc2)^T    rows [Dp, Dp+Cp),    cols [0, Dp)
    r_q0 = Dp + Cp           # q0 column       rows [r_q0, +Dp),    col 0
    r_bi = r_q0 + Dp         # bi column       rows [r_bi, +Dp),    col 0
    r_bc = r_bi + Dp         # folded bias col rows [r_bc, +Cp),    col 0
    rows = r_bc + Cp         # multiple of 8 (Dp, Cp are multiples of 8)
    return r_wi, r_wc, r_q0, r_bi, r_bc, rows


def aggregation_kernel(x_ref, p_ref, out_ref, *, Dp, Cp):
    """x_ref: (F, Dp, TB) batch-in-lanes; p_ref: packed params; out_ref: (Cp, TB)."""
    r_wi, r_wc, r_q0, r_bi, r_bc, _ = _param_layout(Dp, Cp)

    x = x_ref[...].astype(jnp.float32)                       # (F, Dp, TB)

    wiT = p_ref[r_wi:r_wi + Dp, 0:Dp]                        # (Dp, Dp)  = wi^T
    WcT = p_ref[r_wc:r_wc + Cp, 0:Dp]                        # (Cp, Dp)  = (wfc@wfc2)^T
    q0c = p_ref[r_q0:r_q0 + Dp, 0:1]                         # (Dp, 1)
    bic = p_ref[r_bi:r_bi + Dp, 0:1]                         # (Dp, 1)
    bcc = p_ref[r_bc:r_bc + Cp, 0:1]                         # (Cp, 1)

    def softmax_frames(e):                                   # softmax over frames (axis 0)
        m = jnp.max(e, axis=0, keepdims=True)                # (1, TB) sublane reduce (F=8)
        p = jnp.exp(e - m)
        denom = jnp.sum(p, axis=0, keepdims=True)
        return p * pl.reciprocal(denom, approx=True)         # EUP reciprocal (free slot)

    # e0[f, b] = <x[:, :, b][f], q0>
    e0 = jnp.sum(x * q0c[None, :, :], axis=1)                # (F, TB)
    a0 = softmax_frames(e0)                                  # (F, TB)
    r0 = jnp.sum(x * a0[:, None, :], axis=0)                 # (Dp, TB)  plain adds over F

    # intermediate_layer + tanh (bias broadcast along lanes)
    q1 = jnp.tanh(jnp.dot(wiT, r0, preferred_element_type=jnp.float32) + bic)   # (Dp, TB)

    e1 = jnp.sum(x * q1[None, :, :], axis=1)                 # (F, TB)
    a1 = softmax_frames(e1)                                  # (F, TB)
    r1 = jnp.sum(x * a1[:, None, :], axis=0)                 # (Dp, TB)

    # Folded fc -> fc2 (single matmul + bias)
    out = jnp.dot(WcT, r1, preferred_element_type=jnp.float32) + bcc             # (Cp, TB)
    out_ref[...] = out.astype(out_ref.dtype)


def _pack_params(q0_row, wi, bi, wfc, bfc, wfc2, bfc2, Dp, Cp, pad_lanes=128):
    """Pack all parameters into one lane-dense (R, PW) f32 buffer (zero padded)."""
    f32 = jnp.float32
    D = wi.shape[0]
    C = wfc2.shape[1]

    # Fold fc -> fc2 (no nonlinearity between them in forward(); PReLU is unused).
    Wc = wfc.astype(f32) @ wfc2.astype(f32)                        # (D, C)
    bc = bfc.astype(f32) @ wfc2.astype(f32) + bfc2.astype(f32)     # (1, C)

    wiT = wi.astype(f32).T                                         # (D, D)  (out, in)
    WcT = Wc.T                                                     # (C, D)

    PW = max(pad_lanes, _round_up(Dp, pad_lanes))
    r_wi, r_wc, r_q0, r_bi, r_bc, R = _param_layout(Dp, Cp)

    p = jnp.zeros((R, PW), f32)
    p = p.at[r_wi:r_wi + D, 0:D].set(wiT)
    p = p.at[r_wc:r_wc + C, 0:D].set(WcT)
    p = p.at[r_q0:r_q0 + D, 0].set(q0_row[0].astype(f32))
    p = p.at[r_bi:r_bi + D, 0].set(bi[0].astype(f32))
    p = p.at[r_bc:r_bc + C, 0].set(bc[0])
    return p


def _pick_block_batch(B, F, Dp, Cp, x_itemsize, *, vmem_budget=12 << 20, min_blocks=2):
    """Batch (lane) tile, sized against the REAL per-step VMEM footprint:
       2 double-buffered x blocks + ~4 f32 x-sized temporaries + 2 out blocks."""
    bp_min = _round_up(max(B, 1), 128)
    per_col = 2 * F * Dp * x_itemsize + 4 * F * Dp * 4 + 2 * Cp * 4
    tb = (vmem_budget // per_col) // 128 * 128
    tb = int(max(128, min(tb, 2048)))
    tb = min(tb, bp_min)
    # Keep >= min_blocks grid steps when the batch is large enough (v7x dual-TC
    # sharding of the "parallel" axis; DMA/compute overlap everywhere).
    if bp_min >= min_blocks * 128:
        tb = min(tb, _round_up(pl.cdiv(bp_min, min_blocks), 128))
    return tb


def aggregation_forward(x, q0_row, wi, bi, wfc, bfc, wfc2, bfc2, *, block_batch=None):
    """x: (B, F, D); q0_row: (1, D); wi: (D, D) (in,out); bi: (1, D);
       wfc: (D, H); bfc: (1, H); wfc2: (H, C); bfc2: (1, C)."""
    B, F, D = x.shape
    C = wfc2.shape[1]
    Dp = _round_up(D, 8)
    Cp = _round_up(max(C, 8), 8)

    params = _pack_params(q0_row, wi, bi, wfc, bfc, wfc2, bfc2, Dp, Cp)
    R, PW = params.shape

    itemsize = jnp.dtype(x.dtype).itemsize
    if block_batch is not None:
        TB = _round_up(block_batch, 128)
    else:
        TB = _pick_block_batch(B, F, Dp, Cp, itemsize)
    num_blocks = pl.cdiv(B, TB)
    Bp = num_blocks * TB

    # Batch-in-lanes layout: (B, F, D) -> (F, Dp, Bp), zero padded.  Padded
    # batch columns see all-zero features (finite uniform softmax) and padded
    # feature rows carry zero weights/biases, so real outputs are untouched.
    x_t = jnp.transpose(x, (1, 2, 0))
    x_t = jnp.pad(x_t, ((0, 0), (0, Dp - D), (0, Bp - B)))

    kernel = functools.partial(aggregation_kernel, Dp=Dp, Cp=Cp)

    out_t = pl.pallas_call(
        kernel,
        out_shape=jax.ShapeDtypeStruct((Cp, Bp), x.dtype),
        grid_spec=pltpu.PrefetchScalarGridSpec(
            num_scalar_prefetch=0,
            grid=(num_blocks,),
            in_specs=[
                pl.BlockSpec((F, Dp, TB), lambda i: (0, 0, i)),   # streamed x tiles
                pl.BlockSpec((R, PW), lambda i: (0, 0)),           # params: resident
            ],
            out_specs=pl.BlockSpec((Cp, TB), lambda i: (0, i)),    # lane-dense output
        ),
        compiler_params=pltpu.CompilerParams(
            dimension_semantics=("parallel",),
            vmem_limit_bytes=32 * 1024 * 1024,
        ),
    )(x_t, params)

    return out_t[:C, :B].T


def aggregation_reference(x, q0_row, wi, bi, wfc, bfc, wfc2, bfc2):
    """Pure-JAX reference mirroring the PyTorch forward."""
    e0 = jnp.einsum('bfd,d->bf', x, q0_row[0])
    a0 = jax.nn.softmax(e0, axis=1)
    r0 = jnp.sum(x * a0[:, :, None], axis=1)
    q1 = jnp.tanh(r0 @ wi + bi[0])
    e1 = jnp.sum(x * q1[:, None, :], axis=2)
    a1 = jax.nn.softmax(e1, axis=1)
    r1 = jnp.sum(x * a1[:, :, None], axis=1)
    return (r1 @ wfc + bfc[0]) @ wfc2 + bfc2[0]


if __name__ == "__main__":
    # Small shapes consistent with the module: batch=2, frame=8, feat=32,
    # hidden=32, classes=8.
    B, F, D, H, C = 2, 8, 32, 32, 8
    key = jax.random.PRNGKey(0)
    kx, kq0, kwi, kbi, kwfc, kbfc, kwfc2, kbfc2 = jax.random.split(key, 8)

    x = jax.random.normal(kx, (B, F, D), dtype=jnp.float32)

    # Deterministic parameter init (module's q0 is zeros at init; use small random
    # values here so the attention path is actually exercised).
    q0 = 0.1 * jax.random.normal(kq0, (D, 1), dtype=jnp.float32)   # torch shape (D, 1)
    q0_row = q0.T                                                   # (1, D) for the kernel

    wi = 0.1 * jax.random.normal(kwi, (D, D), dtype=jnp.float32)    # (in, out)
    bi = 0.1 * jax.random.normal(kbi, (1, D), dtype=jnp.float32)
    wfc = 0.1 * jax.random.normal(kwfc, (D, H), dtype=jnp.float32)
    bfc = 0.1 * jax.random.normal(kbfc, (1, H), dtype=jnp.float32)
    wfc2 = 0.1 * jax.random.normal(kwfc2, (H, C), dtype=jnp.float32)
    bfc2 = 0.1 * jax.random.normal(kbfc2, (1, C), dtype=jnp.float32)

    out = aggregation_forward(x, q0_row, wi, bi, wfc, bfc, wfc2, bfc2)
    out = jax.block_until_ready(out)

    ref = aggregation_reference(x, q0_row, wi, bi, wfc, bfc, wfc2, bfc2)
    assert out.shape == (B, C)
    # Tolerance accounts for the EUP approximate reciprocal in the softmax and
    # the f32 reassociation from folding fc -> fc2.
    assert jnp.allclose(out, ref, atol=2e-3, rtol=2e-3), "mismatch vs pure-JAX reference"

    print("KERNEL_OK")
</pallas_src>

<mosaic_0001>
module attributes {stable_mosaic.version = 11 : i64} {
  func.func @aggregation_kernel(%arg0: i32, %arg1: memref<8x32x128xf32, #tpu.memory_space<vmem>>, %arg2: memref<112x128xf32, #tpu.memory_space<vmem>>, %arg3: memref<8x128xf32, #tpu.memory_space<vmem>>) attributes {dimension_semantics = [#tpu.dimension_semantics<parallel>], iteration_bounds = array<i64: 1>, scalar_prefetch = 0 : i64, scratch_operands = 0 : i64, tpu.core_type = #tpu.core_type<tc>, window_params = [{transform_indices = @transform_0, window_bounds = array<i64: 8, 32, 128>}, {pipeline_mode = #tpu.pipeline_mode<synchronous>, transform_indices = @transform_1, window_bounds = array<i64: 112, 128>}, {transform_indices = @transform_2, window_bounds = array<i64: 8, 128>}]} {
    %c0 = arith.constant 0 : index
    %c0_0 = arith.constant 0 : index
    %c0_1 = arith.constant 0 : index
    %0 = vector.load %arg1[%c0, %c0_0, %c0_1] : memref<8x32x128xf32, #tpu.memory_space<vmem>>, vector<8x32x128xf32>
    %c0_2 = arith.constant 0 : index
    %c0_3 = arith.constant 0 : index
    %1 = vector.load %arg2[%c0_2, %c0_3] : memref<112x128xf32, #tpu.memory_space<vmem>>, vector<32x32xf32>
    %c32 = arith.constant 32 : index
    %c0_4 = arith.constant 0 : index
    %2 = vector.load %arg2[%c32, %c0_4] : memref<112x128xf32, #tpu.memory_space<vmem>>, vector<8x32xf32>
    %c40 = arith.constant 40 : index
    %c0_5 = arith.constant 0 : index
    %3 = vector.load %arg2[%c40, %c0_5] : memref<112x128xf32, #tpu.memory_space<vmem>>, vector<32x1xf32>
    %c72 = arith.constant 72 : index
    %c0_6 = arith.constant 0 : index
    %4 = vector.load %arg2[%c72, %c0_6] : memref<112x128xf32, #tpu.memory_space<vmem>>, vector<32x1xf32>
    %c104 = arith.constant 104 : index
    %c0_7 = arith.constant 0 : index
    %5 = vector.load %arg2[%c104, %c0_7] : memref<112x128xf32, #tpu.memory_space<vmem>>, vector<8x1xf32>
    %6 = vector.shape_cast %3 : vector<32x1xf32> to vector<1x32x1xf32>
    %7 = vector.broadcast %6 : vector<1x32x1xf32> to vector<8x32x128xf32>
    %8 = arith.mulf %0, %7 : vector<8x32x128xf32>
    %cst = arith.constant dense<0.000000e+00> : vector<8x128xf32>
    %9 = vector.multi_reduction <add>, %8, %cst [1] : vector<8x32x128xf32> to vector<8x128xf32>
    %cst_8 = arith.constant dense<0xFF800000> : vector<128xf32>
    %10 = vector.multi_reduction <maximumf>, %9, %cst_8 [0] : vector<8x128xf32> to vector<128xf32>
    %11 = vector.shape_cast %10 : vector<128xf32> to vector<1x128xf32>
    %12 = vector.broadcast %11 : vector<1x128xf32> to vector<8x128xf32>
    %13 = arith.subf %9, %12 : vector<8x128xf32>
    %14 = math.exp %13 : vector<8x128xf32>
    %cst_9 = arith.constant dense<0.000000e+00> : vector<128xf32>
    %15 = vector.multi_reduction <add>, %14, %cst_9 [0] : vector<8x128xf32> to vector<128xf32>
    %16 = vector.shape_cast %15 : vector<128xf32> to vector<1x128xf32>
    %17 = tpu.reciprocal %16 {approx = true} : vector<1x128xf32> -> vector<1x128xf32>
    %18 = vector.broadcast %17 : vector<1x128xf32> to vector<8x128xf32>
    %19 = arith.mulf %14, %18 : vector<8x128xf32>
    %20 = vector.shape_cast %19 : vector<8x128xf32> to vector<8x1x128xf32>
    %21 = vector.broadcast %20 : vector<8x1x128xf32> to vector<8x32x128xf32>
    %22 = arith.mulf %0, %21 : vector<8x32x128xf32>
    %cst_10 = arith.constant dense<0.000000e+00> : vector<32x128xf32>
    %23 = vector.multi_reduction <add>, %22, %cst_10 [0] : vector<8x32x128xf32> to vector<32x128xf32>
    %cst_11 = arith.constant dense<0.000000e+00> : vector<32x128xf32>
    %24 = tpu.matmul %1, %23, %cst_11 {dimension_numbers = #tpu.dot_dimension_numbers<[1], [0], [0], [1], [0, 0, 1, 1], [], []>} : vector<32x32xf32>, vector<32x128xf32>, vector<32x128xf32> -> vector<32x128xf32>
    %25 = vector.broadcast %4 : vector<32x1xf32> to vector<32x128xf32>
    %26 = arith.addf %24, %25 : vector<32x128xf32>
    %27 = math.tanh %26 : vector<32x128xf32>
    %28 = vector.shape_cast %27 : vector<32x128xf32> to vector<1x32x128xf32>
    %29 = vector.broadcast %28 : vector<1x32x128xf32> to vector<8x32x128xf32>
    %30 = arith.mulf %0, %29 : vector<8x32x128xf32>
    %cst_12 = arith.constant dense<0.000000e+00> : vector<8x128xf32>
    %31 = vector.multi_reduction <add>, %30, %cst_12 [1] : vector<8x32x128xf32> to vector<8x128xf32>
    %cst_13 = arith.constant dense<0xFF800000> : vector<128xf32>
    %32 = vector.multi_reduction <maximumf>, %31, %cst_13 [0] : vector<8x128xf32> to vector<128xf32>
    %33 = vector.shape_cast %32 : vector<128xf32> to vector<1x128xf32>
    %34 = vector.broadcast %33 : vector<1x128xf32> to vector<8x128xf32>
    %35 = arith.subf %31, %34 : vector<8x128xf32>
    %36 = math.exp %35 : vector<8x128xf32>
    %cst_14 = arith.constant dense<0.000000e+00> : vector<128xf32>
    %37 = vector.multi_reduction <add>, %36, %cst_14 [0] : vector<8x128xf32> to vector<128xf32>
    %38 = vector.shape_cast %37 : vector<128xf32> to vector<1x128xf32>
    %39 = tpu.reciprocal %38 {approx = true} : vector<1x128xf32> -> vector<1x128xf32>
    %40 = vector.broadcast %39 : vector<1x128xf32> to vector<8x128xf32>
    %41 = arith.mulf %36, %40 : vector<8x128xf32>
    %42 = vector.shape_cast %41 : vector<8x128xf32> to vector<8x1x128xf32>
    %43 = vector.broadcast %42 : vector<8x1x128xf32> to vector<8x32x128xf32>
    %44 = arith.mulf %0, %43 : vector<8x32x128xf32>
    %cst_15 = arith.constant dense<0.000000e+00> : vector<32x128xf32>
    %45 = vector.multi_reduction <add>, %44, %cst_15 [0] : vector<8x32x128xf32> to vector<32x128xf32>
    %cst_16 = arith.constant dense<0.000000e+00> : vector<8x128xf32>
    %46 = tpu.matmul %2, %45, %cst_16 {dimension_numbers = #tpu.dot_dimension_numbers<[1], [0], [0], [1], [0, 0, 1, 1], [], []>} : vector<8x32xf32>, vector<32x128xf32>, vector<8x128xf32> -> vector<8x128xf32>
    %47 = vector.broadcast %5 : vector<8x1xf32> to vector<8x128xf32>
    %48 = arith.addf %46, %47 : vector<8x128xf32>
    %c0_17 = arith.constant 0 : index
    %c0_18 = arith.constant 0 : index
    %49 = vector.load %arg3[%c0_17, %c0_18] : memref<8x128xf32, #tpu.memory_space<vmem>>, vector<8x128xf32>
    tpu.vector_store %arg3[%c0_17, %c0_18], %48 {strides = array<i32>} : memref<8x128xf32, #tpu.memory_space<vmem>>, vector<8x128xf32>,
    return
  }
  func.func @transform_0(%arg0: i32) -> (i32, i32, i32) {
    %c0_i32 = arith.constant 0 : i32
    %c0_i32_0 = arith.constant 0 : i32
    %c0_i32_1 = arith.constant 0 : i32
    return %c0_i32, %c0_i32_0, %arg0 : i32, i32, i32
  }
  func.func @transform_1(%arg0: i32) -> (i32, i32) {
    %c0_i32 = arith.constant 0 : i32
    %c0_i32_0 = arith.constant 0 : i32
    %c0_i32_1 = arith.constant 0 : i32
    return %c0_i32, %c0_i32_0 : i32, i32
  }
  func.func @transform_2(%arg0: i32) -> (i32, i32) {
    %c0_i32 = arith.constant 0 : i32
    %c0_i32_0 = arith.constant 0 : i32
    return %c0_i32, %arg0 : i32, i32
  }
}

</mosaic_0001>

<bundles_post_ra>
// kernel: tpu_custom_call.1
= control target key start
LH: loop header
LB: loop body
LE: loop exit
PB: predicated region body
PF: predicated region fallthrough
CT: control target
= control target key end

     0   :  { %7 = vsyncpa [#allocation3], 0  ;;  %s1108_s0 = inlined_call_operand.hbm [shape: f32[8,32,128], index: 0, kind: input, shape index: {}]   ;;  %s1109_s1 = inlined_call_operand.hbm [shape: f32[112,128], index: 1, kind: input, shape index: {}]   ;;  %s1110_s2 = inlined_call_operand.hbm [shape: f32[8,128], index: 2, kind: output, shape index: {}]  }
   0x1   :  { %8 = vsyncpa [#allocation6], 0 }
   0x2   :  { %9 = vsyncpa [#allocation4], 0  ;;  %s14_s11 = sshll.u32 %s1108_s0, 4  ;;  %s876_s12 = smov [#allocation2]   ;;  %s15_s11 = int_to_ptr.hbm [resolvable:$true] %s14_s11 }
   0x3   :  { %s16_s13 = sshll.u32 %s876_s12, 4  ;;  %s27_s16 = sshll.u32 %s1109_s1, 4  ;;  %s17_s13 = int_to_ptr.vmem [resolvable:$true] %s16_s13  ;;  %s28_s16 = int_to_ptr.hbm [resolvable:$true] %s27_s16 }
   0x4   :  { %s877_s17 = smov 128   ;;  %s878_s18 = smov 8  }
   0x5   :  { %22 = dma.hbm_to_vmem [thread:$0]  %s15_s11, 4096, %s17_s13, [#allocation3], %s877_s17, %s877_s17, %s878_s18  }
   0x6   :  { %s879_s19 = smov [#allocation5]  }
   0x7   :  { %s29_s20 = sshll.u32 %s879_s19, 4  ;;  %s30_s20 = int_to_ptr.vmem [resolvable:$true] %s29_s20 }
   0x8   :  { %35 = dma.hbm_to_vmem [thread:$0]  %s28_s16, 1792, %s30_s20, [#allocation6], %s877_s17, %s877_s17, %s878_s18  }
   0x9   :  { %870 = dma.done.wait [#allocation3], 4096  }
   0xa   :  { %871 = vsyncadd [#allocation3], 4294963200 }
   0xb   :  { %872 = dma.done.wait [#allocation6], 1792  }
   0xc   :  { %873 = vsyncadd [#allocation6], 4294965504  ;;  %v880_v0 = vmov 0   ;;  %v83_v1 = vld [vmem:[#allocation5 + $0x38] sm:$0xff]  ;;  %v81_v2 = vld [vmem:[#allocation5 + $0x28] sm:$0xff]  ;;  %vm254_vm0 = vcmask 1041409  }
   0xd   :  { %734 = vset.pattern.permute.xlu1 %v880_v0  ;;  %733 = vset.pattern.permute.xlu0 %v880_v0  ;;  %v84_v3 = vld [vmem:[#allocation5 + $0x40] sm:$0xff]  ;;  %v82_v4 = vld [vmem:[#allocation5 + $0x30] sm:$0xff]  ;;  %v87_v6 = vld [vmem:[#allocation5 + $0x58] sm:$0xff]  ;;  %vm257_vm1 = vcmask 1042434   ;;  %vm260_vm2 = vcmask 1043459   ;;  %vm263_vm3 = vcmask 1044484  }
   0xe   :  { %735 = vset.pattern.permute.xlu2 %v880_v0  ;;  %102 = vperm.xlu1 %734, %v83_v1   ;;  %v88_v5 = vld [vmem:[#allocation5 + $0x60] sm:$0xff]  ;;  %v903_v8 = vld [vmem:[#allocation2 + $0x10] sm:$0xff]  ;;  %v939_v29 = vld [vmem:[#allocation2 + $0x18] sm:$0xff]  ;;  %vm266_vm4 = vcmask 1045509   ;;  %vm269_vm5 = vcmask 1046534   ;;  %vm272_vm6 = vcmask 1047559  }
   0xf   :  { %92 = vperm.xlu0 %733, %v81_v2   ;;  %v905_v9 = vld [vmem:[#allocation2 + $0x30] sm:$0xff]  ;;  %v919_v17 = vld [vmem:[#allocation2] sm:$0xff]  ;;  %v941_v30 = vld [vmem:[#allocation2 + $0x38] sm:$0xff]  ;;  %vm379_vm7 = vcmask 261120   ;;  %s881_s0 = smov [#allocation7]   ;;  %s703_s23 = sshll.u32 %s1110_s2, 4  ;;  %s704_s23 = int_to_ptr.hbm [resolvable:$true] %s703_s23 }
  0x10   :  { %v907_v10 = vld [vmem:[#allocation2 + $0x50] sm:$0xff]  ;;  %v921_v18 = vld [vmem:[#allocation2 + $0x20] sm:$0xff]  ;;  %v949_v35 = vld [vmem:[#allocation2 + $0x58] sm:$0xff]  ;;  %s701_s1 = sshll.u32 %s881_s0, 4  ;;  %s702_s1 = int_to_ptr.vmem [resolvable:$true] %s701_s1 }
  0x11   :  { %v909_v12 = vld [vmem:[#allocation2 + $0x70] sm:$0xff]  ;;  %v923_v19 = vld [vmem:[#allocation2 + $0x40] sm:$0xff]  ;;  %v951_v36 = vld [vmem:[#allocation2 + $0x8] sm:$0xff] }
  0x12   :  { %v911_v13 = vld [vmem:[#allocation2 + $0x90] sm:$0xff]  ;;  %v925_v20 = vld [vmem:[#allocation2 + $0x60] sm:$0xff]  ;;  %v953_v37 = vld [vmem:[#allocation2 + $0x28] sm:$0xff] }
  0x13   :  { %v913_v14 = vld [vmem:[#allocation2 + $0xb0] sm:$0xff]  ;;  %v927_v21 = vld [vmem:[#allocation2 + $0x80] sm:$0xff]  ;;  %v959_v42 = vld [vmem:[#allocation2 + $0x48] sm:$0xff] }
  0x14   :  { %v915_v15 = vld [vmem:[#allocation2 + $0xd0] sm:$0xff]  ;;  %1126 = vst [vmem:[#allocation12_spill] sm:$0xff] %v927_v21  ;;  %v929_v22 = vld [vmem:[#allocation2 + $0xa0] sm:$0xff]  ;;  %v961_v43 = vld [vmem:[#allocation2 + $0x68] sm:$0xff] }
  0x15   :  { %v917_v16 = vld [vmem:[#allocation2 + $0xf0] sm:$0xff]  ;;  %1127 = vst [vmem:[#allocation13_spill] sm:$0xff] %v929_v22  ;;  %v931_v23 = vld [vmem:[#allocation2 + $0xc0] sm:$0xff]  ;;  %v963_v44 = vld [vmem:[#allocation2 + $0x88] sm:$0xff] }
  0x16   :  { %107 = vperm.xlu1 %734, %v84_v3   ;;  %1125 = vst [vmem:[#allocation11_spill] sm:$0xff] %v917_v16  ;;  %v937_v28 = vld [vmem:[#allocation2 + $0xe0] sm:$0xff]  ;;  %v969_v51 = vld [vmem:[#allocation2 + $0xa8] sm:$0xff]  ;;  %v983_v62 = vld [vmem:[#allocation2 + $0x78] sm:$0xff] }
  0x17   :  { %97 = vperm.xlu0 %733, %v82_v4   ;;  %1128 = vst [vmem:[#allocation14_spill] sm:$0xff] %v931_v23  ;;  %v971_v52 = vld [vmem:[#allocation2 + $0xc8] sm:$0xff] }
  0x18   :  { %1129 = vst [vmem:[#allocation15_spill] sm:$0xff] %v937_v28  ;;  %v973_v53 = vld [vmem:[#allocation2 + $0xe8] sm:$0xff] }
  0x19   :  { %1130 = vst [vmem:[#allocation16_spill] sm:$0xff] %v969_v51 }
  0x1a   :  { %1131 = vst [vmem:[#allocation17_spill] sm:$0xff] %v971_v52 }
  0x1e   :  { %376 = vperm.xlu1 %734, %v88_v5  }
  0x1f   :  { %371 = vperm.xlu0 %733, %v87_v6  }
  0x80   :  { %v103_v7 = vpop.permute.xlu1 %102 }
  0x81   :  { %v93_v11 = vpop.permute.xlu0 %92  ;;  %v112_v24 = vmul.f32 %v103_v7, %v903_v8  ;;  %v116_v25 = vmul.f32 %v103_v7, %v905_v9  ;;  %v120_v26 = vmul.f32 %v103_v7, %v907_v10  ;;  %v124_v27 = vmul.f32 %v103_v7, %v909_v12 }
  0x82   :  { %v128_v31 = vmul.f32 %v103_v7, %v911_v13  ;;  %v132_v32 = vmul.f32 %v103_v7, %v913_v14  ;;  %v136_v33 = vmul.f32 %v103_v7, %v915_v15  ;;  %v947_v34 = vmul.f32 %v103_v7, %v917_v16  ;;  %v988_v7 = vld [vmem:[#allocation2 + $0x98] sm:$0xff] }
  0x83   :  { %v110_v38 = vmul.f32 %v93_v11, %v919_v17  ;;  %v114_v39 = vmul.f32 %v93_v11, %v921_v18  ;;  %v118_v40 = vmul.f32 %v93_v11, %v923_v19  ;;  %v122_v41 = vmul.f32 %v93_v11, %v925_v20  ;;  %v994_v16 = vld [vmem:[#allocation2 + $0xf8] sm:$0xff] }
  0x84   :  { %v126_v45 = vmul.f32 %v93_v11, %v927_v21  ;;  %v130_v46 = vmul.f32 %v93_v11, %v929_v22  ;;  %v134_v47 = vmul.f32 %v93_v11, %v931_v23  ;;  %v138_v48 = vmul.f32 %v93_v11, %v937_v28  ;;  %v990_v11 = vld [vmem:[#allocation2 + $0xb8] sm:$0xff] }
  0x85   :  { %v992_v28 = vld [vmem:[#allocation2 + $0xd8] sm:$0xff] }
  0x88   :  { %v108_v49 = vpop.permute.xlu1 %107 }
  0x89   :  { %v98_v50 = vpop.permute.xlu0 %97  ;;  %v113_v54 = vmul.f32 %v108_v49, %v939_v29  ;;  %v117_v55 = vmul.f32 %v108_v49, %v941_v30  ;;  %v121_v56 = vmul.f32 %v108_v49, %v949_v35 }
  0x8a   :  { %v111_v57 = vmul.f32 %v98_v50, %v951_v36  ;;  %v115_v58 = vmul.f32 %v98_v50, %v953_v37  ;;  %v119_v59 = vmul.f32 %v98_v50, %v959_v42  ;;  %v123_v60 = vmul.f32 %v98_v50, %v961_v43 }
  0x8b   :  { %v127_v61 = vmul.f32 %v98_v50, %v963_v44  ;;  %v131_v63 = vmul.f32 %v98_v50, %v969_v51  ;;  %v135_v0 = vmul.f32 %v98_v50, %v971_v52  ;;  %v139_v1 = vmul.f32 %v98_v50, %v973_v53 }
  0x8c   :  { %v142_v2 = vadd.f32 %v111_v57, %v110_v38  ;;  %v151_v3 = vadd.f32 %v115_v58, %v114_v39  ;;  %v160_v4 = vadd.f32 %v119_v59, %v118_v40  ;;  %v169_v5 = vadd.f32 %v123_v60, %v122_v41 }
  0x8d   :  { %v178_v6 = vadd.f32 %v127_v61, %v126_v45  ;;  %v187_v22 = vadd.f32 %v131_v63, %v130_v46  ;;  %v196_v21 = vadd.f32 %v135_v0, %v134_v47  ;;  %v125_v52 = vmul.f32 %v108_v49, %v983_v62 }
  0x8e   :  { %v143_v23 = vadd.f32 %v142_v2, %v112_v24  ;;  %v152_v51 = vadd.f32 %v151_v3, %v116_v25  ;;  %v161_v50 = vadd.f32 %v160_v4, %v120_v26  ;;  %v170_v38 = vadd.f32 %v169_v5, %v124_v27 }
  0x8f   :  { %v179_v39 = vadd.f32 %v178_v6, %v128_v31  ;;  %v129_v41 = vmul.f32 %v108_v49, %v988_v7  ;;  %v133_v45 = vmul.f32 %v108_v49, %v990_v11  ;;  %v137_v57 = vmul.f32 %v108_v49, %v992_v28 }
  0x90   :  { %v144_v40 = vadd.f32 %v143_v23, %v113_v54  ;;  %v153_v58 = vadd.f32 %v152_v51, %v117_v55  ;;  %v162_v59 = vadd.f32 %v161_v50, %v121_v56  ;;  %v141_v24 = vmul.f32 %v108_v49, %v994_v16 }
  0x91   :  { %v171_v46 = vadd.f32 %v170_v38, %v125_v52  ;;  %v180_v60 = vadd.f32 %v179_v39, %v129_v41  ;;  %v188_v61 = vadd.f32 %v187_v22, %v132_v32  ;;  %v197_v63 = vadd.f32 %v196_v21, %v136_v33 }
  0x92   :  { %v145_v47 = vrot.slane %v144_v40, 4  ;;  %v154_v25 = vrot.slane %v153_v58, 4  ;;  %v163_v26 = vrot.slane %v162_v59, 4  ;;  %v205_v31 = vadd.f32 %v139_v1, %v138_v48 }
  0x93   :  { %v172_v27 = vrot.slane %v171_v46, 4  ;;  %v181_v54 = vrot.slane %v180_v60, 4  ;;  %v189_v0 = vadd.f32 %v188_v61, %v133_v45  ;;  %v198_v2 = vadd.f32 %v197_v63, %v137_v57 }
  0x94   :  { %v146_v23 = vadd.f32 %v145_v47, %v144_v40  ;;  %v155_v3 = vadd.f32 %v154_v25, %v153_v58  ;;  %v164_v4 = vadd.f32 %v163_v26, %v162_v59  ;;  %v206_v51 = vadd.f32 %v205_v31, %v947_v34 }
  0x95   :  { %v173_v5 = vadd.f32 %v172_v27, %v171_v46  ;;  %v182_v49 = vadd.f32 %v181_v54, %v180_v60  ;;  %v190_v52 = vrot.slane %v189_v0, 4  ;;  %v199_v56 = vrot.slane %v198_v2, 4 }
  0x96   :  { %v147_v55 = vrot.slane %v146_v23, 2  ;;  %v156_v6 = vrot.slane %v155_v3, 2  ;;  %v165_v22 = vrot.slane %v164_v4, 2  ;;  %v207_v32 = vadd.f32 %v206_v51, %v141_v24 }
  0x97   :  { %v174_v21 = vrot.slane %v173_v5, 2  ;;  %v183_v50 = vrot.slane %v182_v49, 2  ;;  %v191_v48 = vadd.f32 %v190_v52, %v189_v0  ;;  %v200_v1 = vadd.f32 %v199_v56, %v198_v2 }
  0x98   :  { %v148_v33 = vadd.f32 %v147_v55, %v146_v23  ;;  %v157_v38 = vadd.f32 %v156_v6, %v155_v3  ;;  %v166_v39 = vadd.f32 %v165_v22, %v164_v4  ;;  %v208_v41 = vrot.slane %v207_v32, 4 }
  0x99   :  { %v175_v40 = vadd.f32 %v174_v21, %v173_v5  ;;  %v184_v57 = vadd.f32 %v183_v50, %v182_v49  ;;  %v192_v58 = vrot.slane %v191_v48, 2  ;;  %v201_v34 = vrot.slane %v200_v1, 2 }
  0x9a   :  { %v149_v45 = vrot.slane %v148_v33, 1  ;;  %v158_v59 = vrot.slane %v157_v38, 1  ;;  %v167_v46 = vrot.slane %v166_v39, 1  ;;  %v209_v47 = vadd.f32 %v208_v41, %v207_v32 }
  0x9b   :  { %v185_v60 = vrot.slane %v184_v57, 1  ;;  %v193_v61 = vadd.f32 %v192_v58, %v191_v48  ;;  %v202_v63 = vadd.f32 %v201_v34, %v200_v1  ;;  %v176_v24 = vrot.slane %v175_v40, 1 }
  0x9c   :  { %v150_v25 = vadd.f32 %v149_v45, %v148_v33  ;;  %v210_v26 = vrot.slane %v209_v47, 2  ;;  %v159_v27 = vadd.f32 %v158_v59, %v157_v38  ;;  %v168_v0 = vadd.f32 %v167_v46, %v166_v39 }
  0x9d   :  { %v186_v31 = vadd.f32 %v185_v60, %v184_v57  ;;  %v194_v23 = vrot.slane %v193_v61, 1  ;;  %v203_v54 = vrot.slane %v202_v63, 1  ;;  %v177_v5 = vadd.f32 %v176_v24, %v175_v40 }
  0x9e   :  { %v211_v2 = vadd.f32 %v210_v26, %v209_v47 }
  0x9f   :  { %v195_v3 = vadd.f32 %v194_v23, %v193_v61  ;;  %v204_v4 = vadd.f32 %v203_v54, %v202_v63  ;;  %v214_v55 = vmax.f32 %v150_v25, %v186_v31 }
  0xa0   :  { %v212_v51 = vrot.slane %v211_v2, 1 }
  0xa1   :  { %v215_v49 = vmax.f32 %v159_v27, %v195_v3  ;;  %v216_v56 = vmax.f32 %v168_v0, %v204_v4 }
  0xa2   :  { %v213_v52 = vadd.f32 %v212_v51, %v211_v2 }
  0xa3   :  { %v218_v22 = vmax.f32 %v214_v55, %v215_v49 }
  0xa4   :  { %v217_v6 = vmax.f32 %v177_v5, %v213_v52 }
  0xa6   :  { %v219_v21 = vmax.f32 %v216_v56, %v217_v6 }
  0xa8   :  { %v220_v32 = vmax.f32 %v218_v22, %v219_v21 }
  0xaa   :  { %v221_v33 = vsub.f32 %v150_v25, %v220_v32  ;;  %v222_v50 = vsub.f32 %v159_v27, %v220_v32  ;;  %v223_v48 = vsub.f32 %v168_v0, %v220_v32  ;;  %v224_v1 = vsub.f32 %v177_v5, %v220_v32 }
  0xab   :  { %v225_v38 = vsub.f32 %v186_v31, %v220_v32  ;;  %v226_v41 = vsub.f32 %v195_v3, %v220_v32  ;;  %v227_v39 = vsub.f32 %v204_v4, %v220_v32  ;;  %v228_v40 = vsub.f32 %v213_v52, %v220_v32 }
  0xac   :  { %v229_v45 = vmul.f32 1.442695, %v221_v33  ;;  %v231_v57 = vmul.f32 1.442695, %v222_v50  ;;  %v233_v58 = vmul.f32 1.442695, %v223_v48 }
  0xad   :  { %v235_v34 = vmul.f32 1.442695, %v224_v1  ;;  %v237_v59 = vmul.f32 1.442695, %v225_v38  ;;  %v239_v46 = vmul.f32 1.442695, %v226_v41 }
  0xae   :  { %736 = vpow2.f32 %v229_v45  ;;  %v241_v47 = vmul.f32 1.442695, %v227_v39  ;;  %v243_v60 = vmul.f32 1.442695, %v228_v40 }
  0xaf   :  { %738 = vpow2.f32 %v231_v57 }
  0xb0   :  { %740 = vpow2.f32 %v233_v58 }
  0xb1   :  { %742 = vpow2.f32 %v235_v34 }
  0xb2   :  { %744 = vpow2.f32 %v237_v59 }
  0xb3   :  { %746 = vpow2.f32 %v239_v46 }
  0xb4   :  { %v737_v61 = vpop.eup %736  ;;  %748 = vpow2.f32 %v241_v47 }
  0xb5   :  { %v739_v63 = vpop.eup %738  ;;  %750 = vpow2.f32 %v243_v60 }
  0xb6   :  { %v741_v25 = vpop.eup %740  ;;  %v253_v24 = vrot.slane %v739_v63, 7 }
  0xb7   :  { %v743_v26 = vpop.eup %742  ;;  %v256_v27 = vrot.slane %v741_v25, 6 }
  0xb8   :  { %v745_v31 = vpop.eup %744  ;;  %v255_v23 = vsel %vm254_vm0, %v253_v24, %v737_v61  ;;  %v259_v54 = vrot.slane %v743_v26, 5 }
  0xb9   :  { %v747_v0 = vpop.eup %746  ;;  %v258_v2 = vsel %vm257_vm1, %v256_v27, %v255_v23  ;;  %v262_v3 = vrot.slane %v745_v31, 4 }
  0xba   :  { %v749_v4 = vpop.eup %748  ;;  %v261_v5 = vsel %vm260_vm2, %v259_v54, %v258_v2  ;;  %v265_v51 = vrot.slane %v747_v0, 3 }
  0xbb   :  { %v751_v55 = vpop.eup %750  ;;  %v264_v49 = vsel %vm263_vm3, %v262_v3, %v261_v5  ;;  %v268_v52 = vrot.slane %v749_v4, 2 }
  0xbc   :  { %v267_v56 = vsel %vm266_vm4, %v265_v51, %v264_v49  ;;  %v271_v6 = vrot.slane %v751_v55, 1 }
  0xbd   :  { %v270_v22 = vsel %vm269_vm5, %v268_v52, %v267_v56 }
  0xbe   :  { %v273_v21 = vsel %vm272_vm6, %v271_v6, %v270_v22 }
  0xbf   :  { %v275_v32 = vrot.slane %v273_v21, 4 }
  0xc1   :  { %v276_v33 = vadd.f32 %v275_v32, %v273_v21 }
  0xc3   :  { %v277_v50 = vrot.slane %v276_v33, 2 }
  0xc5   :  { %v278_v48 = vadd.f32 %v277_v50, %v276_v33 }
  0xc7   :  { %v279_v1 = vrot.slane %v278_v48, 1 }
  0xc9   :  { %v280_v38 = vadd.f32 %v279_v1, %v278_v48 }
  0xcb   :  { %752 = vrcp.f32 %v280_v38 }
  0xd1   :  { %v753_v41 = vpop.eup %752 }
  0xd2   :  { %v282_v39 = vperm.slane %v753_v41, 0 }
  0xd4   :  { %v283_v45 = vmul.f32 %v737_v61, %v282_v39  ;;  %v284_v57 = vmul.f32 %v739_v63, %v282_v39  ;;  %v285_v58 = vmul.f32 %v741_v25, %v282_v39  ;;  %v286_v40 = vmul.f32 %v743_v26, %v282_v39  ;;  %v85_v25 = vld [vmem:[#allocation5 + $0x48] sm:$0xff] }
  0xd5   :  { %v287_v34 = vmul.f32 %v745_v31, %v282_v39  ;;  %v288_v60 = vmul.f32 %v747_v0, %v282_v39  ;;  %v289_v54 = vmul.f32 %v749_v4, %v282_v39  ;;  %v290_v2 = vmul.f32 %v751_v55, %v282_v39  ;;  %361 = vperm.xlu2 %735, %v85_v25  }
  0xd6   :  { %v291_v59 = vperm.slane %v283_v45, 0  ;;  %v292_v46 = vperm.slane %v284_v57, 0  ;;  %v293_v47 = vperm.slane %v285_v58, 0  ;;  %v294_v24 = vperm.slane %v286_v40, 0  ;;  %v86_v58 = vld [vmem:[#allocation5 + $0x50] sm:$0xff] }
  0xd7   :  { %v295_v3 = vperm.slane %v287_v34, 0  ;;  %v296_v26 = vperm.slane %v288_v60, 0  ;;  %v297_v55 = vperm.slane %v289_v54, 0  ;;  %v298_v56 = vperm.slane %v290_v2, 0 }
  0xd8   :  { %v302_v27 = vmul.f32 %v291_v59, %v939_v29  ;;  %v306_v23 = vmul.f32 %v292_v46, %v941_v30  ;;  %v310_v5 = vmul.f32 %v293_v47, %v949_v35  ;;  %v301_v61 = vmul.f32 %v291_v59, %v903_v8 }
  0xd9   :  { %v305_v63 = vmul.f32 %v292_v46, %v905_v9  ;;  %v314_v31 = vmul.f32 %v294_v24, %v983_v62  ;;  %v309_v49 = vmul.f32 %v293_v47, %v907_v10  ;;  %v300_v4 = vmul.f32 %v291_v59, %v951_v36 }
  0xda   :  { %v352_v51 = vadd.f32 %v306_v23, %v302_v27  ;;  %v304_v6 = vmul.f32 %v292_v46, %v953_v37  ;;  %v318_v22 = vmul.f32 %v295_v3, %v988_v7  ;;  %v313_v32 = vmul.f32 %v294_v24, %v909_v12 }
  0xdb   :  { %v345_v52 = vadd.f32 %v305_v63, %v301_v61  ;;  %v308_v50 = vmul.f32 %v293_v47, %v959_v42  ;;  %v299_v1 = vmul.f32 %v291_v59, %v919_v17  ;;  %v303_v38 = vmul.f32 %v292_v46, %v921_v18 }
  0xdc   :  { %v353_v0 = vadd.f32 %v352_v51, %v310_v5  ;;  %v338_v48 = vadd.f32 %v304_v6, %v300_v4  ;;  %v322_v41 = vmul.f32 %v296_v26, %v990_v11  ;;  %v317_v45 = vmul.f32 %v295_v3, %v911_v13  ;;  %v1133_v4 = vld [vmem:[#allocation16_spill] sm:$0xff] }
  0xdd   :  { %v346_v33 = vadd.f32 %v345_v52, %v309_v49  ;;  %v326_v40 = vmul.f32 %v297_v55, %v992_v28  ;;  %v321_v34 = vmul.f32 %v296_v26, %v913_v14  ;;  %v312_v60 = vmul.f32 %v294_v24, %v961_v43  ;;  %366 = vperm.xlu2 %735, %v86_v58   ;;  %v1132_v49 = vld [vmem:[#allocation11_spill] sm:$0xff] }
  0xde   :  { %v354_v21 = vadd.f32 %v353_v0, %v314_v31  ;;  %v339_v27 = vadd.f32 %v338_v48, %v308_v50  ;;  %v307_v59 = vmul.f32 %v293_v47, %v923_v19  ;;  %v331_v2 = vadd.f32 %v303_v38, %v299_v1  ;;  %v1135_v48 = vld [vmem:[#allocation17_spill] sm:$0xff] }
  0xdf   :  { %v347_v57 = vadd.f32 %v346_v33, %v313_v32  ;;  %v330_v46 = vmul.f32 %v298_v56, %v994_v16  ;;  %v325_v5 = vmul.f32 %v297_v55, %v915_v15  ;;  %v316_v51 = vmul.f32 %v295_v3, %v963_v44  ;;  %v1134_v32 = vld [vmem:[#allocation12_spill] sm:$0xff] }
  0xe0   :  { %v355_v39 = vadd.f32 %v354_v21, %v318_v22  ;;  %v340_v61 = vadd.f32 %v339_v27, %v312_v60  ;;  %v311_v31 = vmul.f32 %v294_v24, %v925_v20  ;;  %v332_v0 = vadd.f32 %v331_v2, %v307_v59  ;;  %v77_v2 = vld [vmem:[#allocation5 + $0x8] sm:$0xff] }
  0xe1   :  { %v348_v54 = vadd.f32 %v347_v57, %v317_v45  ;;  %v329_v52 = vmul.f32 %v298_v56, %v1132_v49  ;;  %v320_v6 = vmul.f32 %v296_v26, %v1133_v4  ;;  %v315_v33 = vmul.f32 %v295_v3, %v1134_v32  ;;  %v89_v57 = vld [vmem:[#allocation5 + $0x68] sm:$0xff] }
  0xe2   :  { %v356_v23 = vadd.f32 %v355_v39, %v322_v41  ;;  %v341_v22 = vadd.f32 %v340_v61, %v316_v51  ;;  %v333_v50 = vadd.f32 %v332_v0, %v311_v31  ;;  %v324_v1 = vmul.f32 %v297_v55, %v1135_v48  ;;  %v1136_v39 = vld [vmem:[#allocation13_spill] sm:$0xff]  ;;  %v372_v31 = vpop.permute.xlu0 %371 }
  0xe3   :  { %v349_v25 = vadd.f32 %v348_v54, %v321_v34  ;;  %v319_v45 = vmul.f32 %v296_v26, %v1136_v39  ;;  %v328_v58 = vmul.f32 %v298_v56, %v973_v53  ;;  %v1137_v34 = vld [vmem:[#allocation14_spill] sm:$0xff] }
  0xe4   :  { %v357_v63 = vadd.f32 %v356_v23, %v326_v40  ;;  %v342_v38 = vadd.f32 %v341_v22, %v320_v6  ;;  %v334_v24 = vadd.f32 %v333_v50, %v315_v33  ;;  %v323_v60 = vmul.f32 %v297_v55, %v1137_v34  ;;  %v1138_v23 = vld [vmem:[#allocation15_spill] sm:$0xff]  ;;  %v377_v50 = vpop.permute.xlu1 %376 }
  0xe5   :  { %v350_v21 = vadd.f32 %v349_v25, %v325_v5  ;;  %669 = vperm.xlu2 %735, %v89_v57   ;;  %v327_v54 = vmul.f32 %v298_v56, %v1138_v23  ;;  %v76_v5 = vld [vmem:[#allocation5] sm:$0xff]  ;;  %v79_v55 = vld [vmem:[#allocation5 + $0x18] sm:$0xff] }
  0xe6   :  { %v358_v47 = vadd.f32 %v357_v63, %v330_v46  ;;  %v343_v40 = vadd.f32 %v342_v38, %v324_v1  ;;  %v335_v3 = vadd.f32 %v334_v24, %v319_v45  ;;  %v78_v46 = vld [vmem:[#allocation5 + $0x10] sm:$0xff] }
  0xe7   :  { %v351_v41 = vadd.f32 %v350_v21, %v329_v52 }
  0xe8   :  { %404 = vmatpush.msra.mxu0 %v358_v47  ;;  %719 = vmatpush.msra.mxu2 %v358_v47  ;;  %v344_v27 = vadd.f32 %v343_v40, %v328_v58  ;;  %v336_v59 = vadd.f32 %v335_v3, %v323_v60 }
  0xe9   :  { %720 = vmatpush.msra.mxu3 %v358_v47 }
  0xea   :  { %405 = vmatpush.msra.mxu0 %v351_v41  ;;  %721 = vmatpush.msra.mxu2 %v351_v41  ;;  %v337_v26 = vadd.f32 %v336_v59, %v327_v54 }
  0xeb   :  { %722 = vmatpush.msra.mxu3 %v351_v41 }
  0xec   :  { %406 = vmatpush.msra.mxu0 %v344_v27  ;;  %723 = vmatpush.msra.mxu2 %v344_v27 }
  0xed   :  { %724 = vmatpush.msra.mxu3 %v344_v27 }
  0xee   :  { %407 = vmatpush.msra.mxu0 %v337_v26  ;;  %725 = vmatpush.msra.mxu2 %v337_v26 }
  0xef   :  { %726 = vmatpush.msra.mxu3 %v337_v26  ;;  %715 = vmatmul.msk.f32.vlgmr.msra.gmra.mxu2 %vm379_vm7, %v77_v2 }
  0xf0   :  { %716 = vmatmul.msk.f32.vlgmr.msra.gmra.mxu3 %vm379_vm7, %v78_v46  ;;  %714 = vmatmul.msk.f32.vlgmr.msra.gmra.mxu0 %vm379_vm7, %v76_v5 }
  0xf8   :  { %717 = vmatmul.msk.f32.gmra.mxu3 %vm379_vm7, %v79_v55 }
 0x12f   :  { %v362_v56 = vpop.permute.xlu2 %361 }
 0x137   :  { %v367_v63 = vpop.permute.xlu2 %366 }
 0x16d   :  { %v409_v51 = vpop.f32.mrf.mxu0 }
 0x16e   :  { %v410_v61 = vadd.f32 %v409_v51, %v362_v56 }
 0x170   :  { %754 = vtanh.f32 %v410_v61 }
 0x172   :  { %v412_v25 = vpop.f32.mrf.mxu2 }
 0x173   :  { %v413_v0 = vadd.f32 %v412_v25, %v367_v63  ;;  %v415_v52 = vpop.f32.mrf.mxu3 }
 0x174   :  { %v416_v6 = vadd.f32 %v415_v52, %v372_v31 }
 0x175   :  { %756 = vtanh.f32 %v413_v0 }
 0x176   :  { %758 = vtanh.f32 %v416_v6  ;;  %v755_v22 = vpop.eup %754 }
 0x177   :  { %v425_v47 = vmul.f32 %v755_v22, %v919_v17  ;;  %v429_v21 = vmul.f32 %v755_v22, %v921_v18  ;;  %v433_v38 = vmul.f32 %v755_v22, %v923_v19  ;;  %v437_v41 = vmul.f32 %v755_v22, %v925_v20 }
 0x178   :  { %v441_v45 = vmul.f32 %v755_v22, %v1134_v32  ;;  %v445_v24 = vmul.f32 %v755_v22, %v1136_v39  ;;  %v449_v17 = vmul.f32 %v755_v22, %v1137_v34  ;;  %v453_v20 = vmul.f32 %v755_v22, %v1138_v23 }
 0x17b   :  { %v757_v33 = vpop.eup %756  ;;  %v418_v1 = vpop.f32.mrf.mxu3 }
 0x17c   :  { %v759_v57 = vpop.eup %758  ;;  %v419_v58 = vadd.f32 %v418_v1, %v377_v50  ;;  %v426_v40 = vmul.f32 %v757_v33, %v951_v36  ;;  %v430_v60 = vmul.f32 %v757_v33, %v953_v37  ;;  %v434_v3 = vmul.f32 %v757_v33, %v959_v42 }
 0x17d   :  { %v427_v18 = vmul.f32 %v759_v57, %v903_v8  ;;  %v438_v19 = vmul.f32 %v757_v33, %v961_v43  ;;  %v431_v32 = vmul.f32 %v759_v57, %v905_v9  ;;  %v435_v39 = vmul.f32 %v759_v57, %v907_v10 }
 0x17e   :  { %760 = vtanh.f32 %v419_v58  ;;  %v442_v27 = vmul.f32 %v757_v33, %v963_v44  ;;  %v439_v54 = vmul.f32 %v759_v57, %v909_v12  ;;  %v443_v59 = vmul.f32 %v759_v57, %v911_v13 }
 0x17f   :  { %v446_v34 = vmul.f32 %v757_v33, %v1133_v4  ;;  %v450_v8 = vmul.f32 %v757_v33, %v1135_v48  ;;  %v447_v26 = vmul.f32 %v759_v57, %v913_v14  ;;  %v454_v2 = vmul.f32 %v757_v33, %v973_v53 }
 0x180   :  { %v457_v23 = vadd.f32 %v426_v40, %v425_v47  ;;  %v466_v46 = vadd.f32 %v430_v60, %v429_v21  ;;  %v475_v5 = vadd.f32 %v434_v3, %v433_v38  ;;  %v484_v9 = vadd.f32 %v438_v19, %v437_v41 }
 0x181   :  { %v493_v55 = vadd.f32 %v442_v27, %v441_v45  ;;  %v502_v10 = vadd.f32 %v446_v34, %v445_v24  ;;  %v451_v56 = vmul.f32 %v759_v57, %v915_v15  ;;  %v455_v12 = vmul.f32 %v759_v57, %v1132_v49 }
 0x182   :  { %v511_v51 = vadd.f32 %v450_v8, %v449_v17  ;;  %v520_v13 = vadd.f32 %v454_v2, %v453_v20  ;;  %v458_v61 = vadd.f32 %v457_v23, %v427_v18  ;;  %v467_v63 = vadd.f32 %v466_v46, %v431_v32 }
 0x183   :  { %v476_v25 = vadd.f32 %v475_v5, %v435_v39  ;;  %v485_v48 = vadd.f32 %v484_v9, %v439_v54  ;;  %v494_v14 = vadd.f32 %v493_v55, %v443_v59  ;;  %v503_v0 = vadd.f32 %v502_v10, %v447_v26 }
 0x184   :  { %v761_v31 = vpop.eup %760  ;;  %v512_v53 = vadd.f32 %v511_v51, %v451_v56  ;;  %v521_v52 = vadd.f32 %v520_v13, %v455_v12 }
 0x185   :  { %v428_v6 = vmul.f32 %v761_v31, %v939_v29  ;;  %v432_v22 = vmul.f32 %v761_v31, %v941_v30  ;;  %v436_v47 = vmul.f32 %v761_v31, %v949_v35  ;;  %v440_v15 = vmul.f32 %v761_v31, %v983_v62 }
 0x186   :  { %v444_v49 = vmul.f32 %v761_v31, %v988_v7  ;;  %v448_v21 = vmul.f32 %v761_v31, %v990_v11  ;;  %v452_v33 = vmul.f32 %v761_v31, %v992_v28  ;;  %v456_v50 = vmul.f32 %v761_v31, %v994_v16 }
 0x187   :  { %v459_v1 = vadd.f32 %v458_v61, %v428_v6  ;;  %v468_v38 = vadd.f32 %v467_v63, %v432_v22  ;;  %v477_v41 = vadd.f32 %v476_v25, %v436_v47  ;;  %v486_v45 = vadd.f32 %v485_v48, %v440_v15 }
 0x188   :  { %v495_v24 = vadd.f32 %v494_v14, %v444_v49  ;;  %v504_v57 = vadd.f32 %v503_v0, %v448_v21  ;;  %v513_v58 = vadd.f32 %v512_v53, %v452_v33  ;;  %v522_v40 = vadd.f32 %v521_v52, %v456_v50 }
 0x189   :  { %v460_v60 = vrot.slane %v459_v1, 4  ;;  %v469_v17 = vrot.slane %v468_v38, 4  ;;  %v478_v18 = vrot.slane %v477_v41, 4  ;;  %v487_v3 = vrot.slane %v486_v45, 4 }
 0x18a   :  { %v496_v19 = vrot.slane %v495_v24, 4  ;;  %v505_v20 = vrot.slane %v504_v57, 4  ;;  %v514_v32 = vrot.slane %v513_v58, 4  ;;  %v523_v39 = vrot.slane %v522_v40, 4 }
 0x18b   :  { %v461_v27 = vadd.f32 %v460_v60, %v459_v1  ;;  %v470_v54 = vadd.f32 %v469_v17, %v468_v38  ;;  %v479_v59 = vadd.f32 %v478_v18, %v477_v41  ;;  %v488_v34 = vadd.f32 %v487_v3, %v486_v45 }
 0x18c   :  { %v497_v8 = vadd.f32 %v496_v19, %v495_v24  ;;  %v506_v26 = vadd.f32 %v505_v20, %v504_v57  ;;  %v515_v2 = vadd.f32 %v514_v32, %v513_v58  ;;  %v524_v23 = vadd.f32 %v523_v39, %v522_v40 }
 0x18d   :  { %v462_v46 = vrot.slane %v461_v27, 2  ;;  %v471_v5 = vrot.slane %v470_v54, 2  ;;  %v480_v9 = vrot.slane %v479_v59, 2  ;;  %v489_v55 = vrot.slane %v488_v34, 2 }
 0x18e   :  { %v498_v10 = vrot.slane %v497_v8, 2  ;;  %v507_v56 = vrot.slane %v506_v26, 2  ;;  %v516_v12 = vrot.slane %v515_v2, 2  ;;  %v525_v51 = vrot.slane %v524_v23, 2 }
 0x18f   :  { %v463_v13 = vadd.f32 %v462_v46, %v461_v27  ;;  %v472_v61 = vadd.f32 %v471_v5, %v470_v54  ;;  %v481_v63 = vadd.f32 %v480_v9, %v479_v59  ;;  %v490_v25 = vadd.f32 %v489_v55, %v488_v34 }
 0x190   :  { %v499_v48 = vadd.f32 %v498_v10, %v497_v8  ;;  %v508_v31 = vadd.f32 %v507_v56, %v506_v26  ;;  %v517_v14 = vadd.f32 %v516_v12, %v515_v2  ;;  %v526_v0 = vadd.f32 %v525_v51, %v524_v23 }
 0x191   :  { %v464_v53 = vrot.slane %v463_v13, 1  ;;  %v473_v52 = vrot.slane %v472_v61, 1  ;;  %v482_v6 = vrot.slane %v481_v63, 1  ;;  %v491_v22 = vrot.slane %v490_v25, 1 }
 0x192   :  { %v500_v47 = vrot.slane %v499_v48, 1  ;;  %v509_v15 = vrot.slane %v508_v31, 1  ;;  %v518_v49 = vrot.slane %v517_v14, 1  ;;  %v527_v21 = vrot.slane %v526_v0, 1 }
 0x193   :  { %v465_v33 = vadd.f32 %v464_v53, %v463_v13  ;;  %v474_v50 = vadd.f32 %v473_v52, %v472_v61  ;;  %v483_v1 = vadd.f32 %v482_v6, %v481_v63  ;;  %v492_v38 = vadd.f32 %v491_v22, %v490_v25 }
 0x194   :  { %v501_v41 = vadd.f32 %v500_v47, %v499_v48  ;;  %v510_v45 = vadd.f32 %v509_v15, %v508_v31  ;;  %v519_v24 = vadd.f32 %v518_v49, %v517_v14  ;;  %v528_v57 = vadd.f32 %v527_v21, %v526_v0 }
 0x196   :  { %v529_v58 = vmax.f32 %v465_v33, %v501_v41  ;;  %v530_v40 = vmax.f32 %v474_v50, %v510_v45  ;;  %v531_v60 = vmax.f32 %v483_v1, %v519_v24  ;;  %v532_v17 = vmax.f32 %v492_v38, %v528_v57 }
 0x198   :  { %v533_v18 = vmax.f32 %v529_v58, %v530_v40  ;;  %v534_v3 = vmax.f32 %v531_v60, %v532_v17 }
 0x19a   :  { %v535_v19 = vmax.f32 %v533_v18, %v534_v3 }
 0x19c   :  { %v536_v20 = vsub.f32 %v465_v33, %v535_v19  ;;  %v537_v32 = vsub.f32 %v474_v50, %v535_v19  ;;  %v538_v39 = vsub.f32 %v483_v1, %v535_v19  ;;  %v539_v27 = vsub.f32 %v492_v38, %v535_v19 }
 0x19d   :  { %v540_v54 = vsub.f32 %v501_v41, %v535_v19  ;;  %v541_v59 = vsub.f32 %v510_v45, %v535_v19  ;;  %v542_v34 = vsub.f32 %v519_v24, %v535_v19  ;;  %v543_v23 = vsub.f32 %v528_v57, %v535_v19 }
 0x19e   :  { %v544_v8 = vmul.f32 1.442695, %v536_v20  ;;  %v546_v26 = vmul.f32 1.442695, %v537_v32  ;;  %v548_v2 = vmul.f32 1.442695, %v538_v39 }
 0x19f   :  { %v550_v46 = vmul.f32 1.442695, %v539_v27  ;;  %v552_v5 = vmul.f32 1.442695, %v540_v54  ;;  %v554_v9 = vmul.f32 1.442695, %v541_v59 }
 0x1a0   :  { %762 = vpow2.f32 %v544_v8  ;;  %v556_v55 = vmul.f32 1.442695, %v542_v34  ;;  %v558_v10 = vmul.f32 1.442695, %v543_v23 }
 0x1a1   :  { %764 = vpow2.f32 %v546_v26 }
 0x1a2   :  { %766 = vpow2.f32 %v548_v2 }
 0x1a3   :  { %768 = vpow2.f32 %v550_v46 }
 0x1a4   :  { %770 = vpow2.f32 %v552_v5 }
 0x1a5   :  { %772 = vpow2.f32 %v554_v9  ;;  %v780_v9 = vld [vmem:[#allocation2 + $0x10] sm:$0xff] }
 0x1a6   :  { %v763_v56 = vpop.eup %762  ;;  %774 = vpow2.f32 %v556_v55 }
 0x1a7   :  { %v765_v12 = vpop.eup %764  ;;  %776 = vpow2.f32 %v558_v10  ;;  %v781_v10 = vld [vmem:[#allocation2 + $0x30] sm:$0xff] }
 0x1a8   :  { %v767_v51 = vpop.eup %766  ;;  %v568_v13 = vrot.slane %v765_v12, 7 }
 0x1a9   :  { %v769_v61 = vpop.eup %768  ;;  %v570_v63 = vrot.slane %v767_v51, 6 }
 0x1aa   :  { %v771_v25 = vpop.eup %770  ;;  %v569_v48 = vsel %vm254_vm0, %v568_v13, %v763_v56  ;;  %v572_v31 = vrot.slane %v769_v61, 5 }
 0x1ab   :  { %v773_v14 = vpop.eup %772  ;;  %v571_v0 = vsel %vm257_vm1, %v570_v63, %v569_v48  ;;  %v574_v53 = vrot.slane %v771_v25, 4 }
 0x1ac   :  { %v775_v52 = vpop.eup %774  ;;  %v573_v6 = vsel %vm260_vm2, %v572_v31, %v571_v0  ;;  %v576_v22 = vrot.slane %v773_v14, 3  ;;  %v783_v0 = vld [vmem:[#allocation2 + $0x70] sm:$0xff] }
 0x1ad   :  { %v777_v47 = vpop.eup %776  ;;  %v575_v15 = vsel %vm263_vm3, %v574_v53, %v573_v6  ;;  %v578_v49 = vrot.slane %v775_v52, 2 }
 0x1ae   :  { %v577_v21 = vsel %vm266_vm4, %v576_v22, %v575_v15  ;;  %v580_v33 = vrot.slane %v777_v47, 1  ;;  %v784_v22 = vld [vmem:[#allocation2] sm:$0xff] }
 0x1af   :  { %v579_v50 = vsel %vm269_vm5, %v578_v49, %v577_v21  ;;  %v785_v15 = vld [vmem:[#allocation2 + $0x20] sm:$0xff] }
 0x1b0   :  { %v581_v1 = vsel %vm272_vm6, %v580_v33, %v579_v50  ;;  %v786_v33 = vld [vmem:[#allocation2 + $0x90] sm:$0xff] }
 0x1b1   :  { %v583_v38 = vrot.slane %v581_v1, 4 }
 0x1b3   :  { %v584_v41 = vadd.f32 %v583_v38, %v581_v1 }
 0x1b5   :  { %v585_v45 = vrot.slane %v584_v41, 2 }
 0x1b7   :  { %v586_v24 = vadd.f32 %v585_v45, %v584_v41 }
 0x1b9   :  { %v587_v57 = vrot.slane %v586_v24, 1 }
 0x1bb   :  { %v588_v58 = vadd.f32 %v587_v57, %v586_v24  ;;  %v788_v57 = vld [vmem:[#allocation2 + $0x40] sm:$0xff] }
 0x1bd   :  { %778 = vrcp.f32 %v588_v58 }
 0x1c3   :  { %v779_v40 = vpop.eup %778 }
 0x1c4   :  { %v590_v60 = vperm.slane %v779_v40, 0 }
 0x1c6   :  { %v591_v17 = vmul.f32 %v763_v56, %v590_v60  ;;  %v592_v18 = vmul.f32 %v765_v12, %v590_v60  ;;  %v593_v3 = vmul.f32 %v767_v51, %v590_v60  ;;  %v594_v19 = vmul.f32 %v769_v61, %v590_v60  ;;  %v782_v61 = vld [vmem:[#allocation2 + $0x50] sm:$0xff] }
 0x1c7   :  { %v595_v20 = vmul.f32 %v771_v25, %v590_v60  ;;  %v596_v54 = vmul.f32 %v773_v14, %v590_v60  ;;  %v597_v26 = vmul.f32 %v775_v52, %v590_v60  ;;  %v598_v2 = vmul.f32 %v777_v47, %v590_v60 }
 0x1c8   :  { %v599_v32 = vperm.slane %v591_v17, 0  ;;  %v600_v39 = vperm.slane %v592_v18, 0  ;;  %v601_v27 = vperm.slane %v593_v3, 0  ;;  %v602_v59 = vperm.slane %v594_v19, 0 }
 0x1c9   :  { %v603_v23 = vperm.slane %v595_v20, 0  ;;  %v604_v12 = vperm.slane %v596_v54, 0  ;;  %v1089_v48 = vperm.slane %v598_v2, 0  ;;  %v790_v20 = vld [vmem:[#allocation2 + $0x60] sm:$0xff] }
 0x1ca   :  { %v610_v34 = vmul.f32 %v599_v32, %v939_v29  ;;  %v614_v8 = vmul.f32 %v600_v39, %v941_v30  ;;  %v618_v46 = vmul.f32 %v601_v27, %v949_v35  ;;  %v609_v55 = vmul.f32 %v780_v9, %v599_v32  ;;  %v792_v2 = vld [vmem:[#allocation2 + $0x80] sm:$0xff] }
 0x1cb   :  { %v613_v56 = vmul.f32 %v781_v10, %v600_v39  ;;  %v622_v51 = vmul.f32 %v602_v59, %v983_v62  ;;  %v617_v63 = vmul.f32 %v782_v61, %v601_v27  ;;  %v608_v29 = vmul.f32 %v599_v32, %v951_v36  ;;  %v794_v10 = vld [vmem:[#allocation2 + $0xa0] sm:$0xff] }
 0x1cc   :  { %v660_v5 = vadd.f32 %v614_v8, %v610_v34  ;;  %v605_v30 = vperm.slane %v597_v26, 0  ;;  %v612_v31 = vmul.f32 %v600_v39, %v953_v37  ;;  %v626_v35 = vmul.f32 %v603_v23, %v988_v7  ;;  %v787_v7 = vld [vmem:[#allocation2 + $0xb0] sm:$0xff] }
 0x1cd   :  { %v653_v25 = vadd.f32 %v613_v56, %v609_v55  ;;  %v621_v53 = vmul.f32 %v783_v0, %v602_v59  ;;  %v616_v6 = vmul.f32 %v601_v27, %v959_v42  ;;  %v607_v47 = vmul.f32 %v784_v22, %v599_v32  ;;  %v80_v0 = vld [vmem:[#allocation5 + $0x20] sm:$0xff] }
 0x1ce   :  { %v661_v13 = vadd.f32 %v660_v5, %v618_v46  ;;  %v646_v62 = vadd.f32 %v612_v31, %v608_v29  ;;  %v611_v49 = vmul.f32 %v785_v15, %v600_v39  ;;  %v630_v36 = vmul.f32 %v604_v12, %v990_v11  ;;  %v789_v11 = vld [vmem:[#allocation2 + $0xd0] sm:$0xff]  ;;  %v793_v5 = vld [vmem:[#allocation2 + $0xc8] sm:$0xff]  ;;  %v797_v31 = vld [vmem:[#allocation2 + $0xe0] sm:$0xff] }
 0x1cf   :  { %v654_v52 = vadd.f32 %v653_v25, %v617_v63  ;;  %v625_v50 = vmul.f32 %v786_v33, %v603_v23  ;;  %v634_v37 = vmul.f32 %v605_v30, %v992_v28  ;;  %v629_v38 = vmul.f32 %v787_v7, %v604_v12 }
 0x1d0   :  { %v662_v14 = vadd.f32 %v661_v13, %v622_v51  ;;  %v620_v41 = vmul.f32 %v602_v59, %v961_v43  ;;  %v647_v45 = vadd.f32 %v646_v62, %v616_v6  ;;  %v615_v58 = vmul.f32 %v788_v57, %v601_v27  ;;  %v791_v43 = vld [vmem:[#allocation2 + $0xf0] sm:$0xff]  ;;  %v795_v51 = vld [vmem:[#allocation2 + $0xe8] sm:$0xff] }
 0x1d1   :  { %v655_v1 = vadd.f32 %v654_v52, %v621_v53  ;;  %v639_v40 = vadd.f32 %v611_v49, %v607_v47  ;;  %v638_v60 = vmul.f32 %v1089_v48, %v994_v16  ;;  %v633_v17 = vmul.f32 %v789_v11, %v605_v30 }
 0x1d2   :  { %v663_v21 = vadd.f32 %v662_v14, %v626_v35  ;;  %v624_v18 = vmul.f32 %v603_v23, %v963_v44  ;;  %v648_v3 = vadd.f32 %v647_v45, %v620_v41  ;;  %v619_v32 = vmul.f32 %v790_v20, %v602_v59 }
 0x1d3   :  { %v656_v42 = vadd.f32 %v655_v1, %v625_v50  ;;  %v640_v39 = vadd.f32 %v639_v40, %v615_v58  ;;  %v637_v54 = vmul.f32 %v791_v43, %v1089_v48  ;;  %v628_v34 = vmul.f32 %v604_v12, %v1133_v4  ;;  %v796_v4 = vld [vmem:[#allocation2 + $0xc0] sm:$0xff] }
 0x1d4   :  { %v664_v24 = vadd.f32 %v663_v21, %v630_v36  ;;  %v649_v27 = vadd.f32 %v648_v3, %v624_v18  ;;  %v623_v16 = vmul.f32 %v792_v2, %v603_v23  ;;  %v632_v9 = vmul.f32 %v793_v5, %v605_v30 }
 0x1d5   :  { %v657_v28 = vadd.f32 %v656_v42, %v629_v38  ;;  %v641_v46 = vadd.f32 %v640_v39, %v619_v32  ;;  %v627_v56 = vmul.f32 %v794_v10, %v604_v12  ;;  %v636_v13 = vmul.f32 %v795_v51, %v1089_v48  ;;  %v670_v12 = vpop.permute.xlu2 %669 }
 0x1d6   :  { %v665_v19 = vadd.f32 %v664_v24, %v634_v37  ;;  %v650_v44 = vadd.f32 %v649_v27, %v628_v34  ;;  %v631_v63 = vmul.f32 %v796_v4, %v605_v30  ;;  %v635_v23 = vmul.f32 %v797_v31, %v1089_v48 }
 0x1d7   :  { %v658_v26 = vadd.f32 %v657_v28, %v633_v17  ;;  %v642_v59 = vadd.f32 %v641_v46, %v623_v16 }
 0x1d8   :  { %v666_v8 = vadd.f32 %v665_v19, %v638_v60  ;;  %v651_v61 = vadd.f32 %v650_v44, %v632_v9 }
 0x1d9   :  { %v659_v55 = vadd.f32 %v658_v26, %v637_v54  ;;  %v643_v25 = vadd.f32 %v642_v59, %v627_v56 }
 0x1da   :  { %687 = vmatpush.msra.mxu1 %v666_v8  ;;  %v652_v29 = vadd.f32 %v651_v61, %v636_v13 }
 0x1db   :  { %v644_v35 = vadd.f32 %v643_v25, %v631_v63 }
 0x1dc   :  { %688 = vmatpush.msra.mxu1 %v659_v55 }
 0x1dd   :  { %v645_v14 = vadd.f32 %v644_v35, %v635_v23 }
 0x1de   :  { %689 = vmatpush.msra.mxu1 %v652_v29 }
 0x1e0   :  { %690 = vmatpush.msra.mxu1 %v645_v14 }
 0x1e1   :  { %718 = vmatmul.msk.f32.vlgmr.msra.gmra.mxu1 %vm379_vm7, %v80_v0 }
 0x25e   :  { %v692_v30 = vpop.f32.mrf.mxu1 }
 0x25f   :  { %v693_v53 = vadd.f32 %v692_v30, %v670_v12 }
 0x261   :  { %695 = vst [vmem:[#allocation7] sm:$0xff] %v693_v53 }
 0x262   :  { %706 = dma.vmem_to_hbm [thread:$0]  %s702_s1, 128, %s704_s23, [#allocation4]  }
 0x263   :  { %874 = dma.done.wait [#allocation4], 128  }
 0x264   :  { %875 = vsyncadd [#allocation4], 4294967168 }
 0x265   :  { %711 = vsyncpa [#allocation3], 1 }
 0x266   :  { %712 = vsyncpa [#allocation6], 1 }
 0x267   :  { %713 = vsyncpa [#allocation4], 1 }

</bundles_post_ra>
